<compile_context>
chip_gen: v7x
topology: tpu7x:2x2x1
jax: 0.10.0
libtpu: 0.0.40
codegen_flags: <defaults>
</compile_context>

<pallas_src>
import math

import jax
import jax.numpy as jnp
from jax.experimental import pallas as pl
from jax.experimental.pallas import tpu as pltpu

LN_EPS = 1e-5                        # PyTorch nn.LayerNorm default
_INV_SQRT2 = 1.0 / math.sqrt(2.0)


def _round_up(n, m):
    return ((n + m - 1) // m) * m


def _ffn_kernel(x_ref, g_ref, beta_ref, w1_ref, b1_ref, w2_ref, b2_ref,
                o_ref, xn_ref, acc_ref):
    """Grid = (token tiles [parallel], hidden panels [arbitrary, innermost])."""
    k = pl.program_id(1)

    # ---- LayerNorm (f32) once per token tile; cache bf16 result in scratch ----
    @pl.when(k == 0)
    def _():
        x = x_ref[...].astype(jnp.float32)
        mu = jnp.mean(x, axis=-1, keepdims=True)
        var = jnp.mean((x - mu) * (x - mu), axis=-1, keepdims=True)
        xn = (x - mu) * jax.lax.rsqrt(var + LN_EPS)
        xn = xn * g_ref[...] + beta_ref[...]
        xn_ref[...] = xn.astype(xn_ref.dtype)
        acc_ref[...] = jnp.zeros_like(acc_ref)

    # ---- Linear(dim -> hidden panel): bf16 operands, f32 accumulation (MXU) ----
    h = jnp.dot(xn_ref[...], w1_ref[...], preferred_element_type=jnp.float32)
    h = h + b1_ref[...]

    # ---- exact GELU (PyTorch nn.GELU default: erf form) ----
    h = 0.5 * h * (1.0 + jax.lax.erf(h * _INV_SQRT2))

    # TODO(synk): Dropout(p=0.0) is the identity at inference; omitted.

    # ---- Linear(hidden panel -> dim), accumulated across hidden panels ----
    acc_ref[...] += jnp.dot(h.astype(w2_ref.dtype), w2_ref[...],
                            preferred_element_type=jnp.float32)

    @pl.when(k == pl.num_programs(1) - 1)
    def _():
        o_ref[...] = (acc_ref[...] + b2_ref[...]).astype(o_ref.dtype)


def feed_forward(x, gamma, beta, w1, b1, w2, b2, *, tm=256, th=None,
                 matmul_dtype=jnp.bfloat16):
    """x: [B, S, D]; w1: [D, H], w2: [H, D] (transposed vs. PyTorch layout)."""
    B, S, D = x.shape
    H = w1.shape[1]
    T = B * S

    # Token tile: as large as requested, 8-aligned, never larger than needed.
    tm_eff = min(tm, _round_up(T, 8))
    T_pad = _round_up(T, tm_eff)

    # Hidden panel: 128/256-aligned slice when H is large, else the whole H.
    if th is None:
        th = 512 if (H > 512 and H % 512 == 0) else H
    assert H % th == 0 and (th == H or th % 128 == 0), "bad hidden tile"

    x2 = x.reshape(T, D)
    if T_pad != T:
        # Padded rows are computed harmlessly (per-row LN/matmul) and sliced off.
        x2 = jnp.pad(x2, ((0, T_pad - T), (0, 0)))

    g2 = gamma.reshape(1, D).astype(jnp.float32)
    be2 = beta.reshape(1, D).astype(jnp.float32)
    w1c = w1.astype(matmul_dtype)
    w2c = w2.astype(matmul_dtype)
    b1_2 = b1.reshape(1, H).astype(jnp.float32)
    b2_2 = b2.reshape(1, D).astype(jnp.float32)

    grid = (T_pad // tm_eff, H // th)

    # VMEM budget estimate: double-buffered I/O tiles + weight panels + scratch.
    xi = jnp.dtype(x.dtype).itemsize
    wi = jnp.dtype(matmul_dtype).itemsize
    est = (4 * tm_eff * D * xi                 # x + out tiles (double-buffered)
           + 2 * 2 * D * th * wi               # W1 + W2 panels (double-buffered)
           + 2 * (th + 3 * D) * 4              # biases + gamma/beta
           + tm_eff * D * (wi + 4)             # xn + acc scratch
           + tm_eff * th * 4)                  # hidden intermediate
    vmem_limit = int(min(max(2 * est, 32 * 1024 * 1024), 56 * 1024 * 1024))

    out2 = pl.pallas_call(
        _ffn_kernel,
        out_shape=jax.ShapeDtypeStruct((T_pad, D), x.dtype),
        grid_spec=pltpu.PrefetchScalarGridSpec(
            num_scalar_prefetch=0,
            grid=grid,
            in_specs=[
                pl.BlockSpec((tm_eff, D), lambda i, k: (i, 0)),   # x tokens
                pl.BlockSpec((1, D), lambda i, k: (0, 0)),        # LN gamma
                pl.BlockSpec((1, D), lambda i, k: (0, 0)),        # LN beta
                pl.BlockSpec((D, th), lambda i, k: (0, k)),       # W1 panel
                pl.BlockSpec((1, th), lambda i, k: (0, k)),       # b1 panel
                pl.BlockSpec((th, D), lambda i, k: (k, 0)),       # W2 panel
                pl.BlockSpec((1, D), lambda i, k: (0, 0)),        # b2
            ],
            out_specs=pl.BlockSpec((tm_eff, D), lambda i, k: (i, 0)),
            scratch_shapes=[
                pltpu.VMEM((tm_eff, D), matmul_dtype),   # cached LN output
                pltpu.VMEM((tm_eff, D), jnp.float32),    # output accumulator
            ],
        ),
        compiler_params=pltpu.CompilerParams(
            dimension_semantics=("parallel", "arbitrary"),
            vmem_limit_bytes=vmem_limit,
        ),
    )(x2, g2, be2, w1c, b1_2, w2c, b2_2)

    if T_pad != T:
        out2 = out2[:T]
    return out2.reshape(B, S, D)


def _reference(x, gamma, beta, w1, b1, w2, b2):
    xf = x.astype(jnp.float32)
    mu = jnp.mean(xf, axis=-1, keepdims=True)
    var = jnp.mean((xf - mu) ** 2, axis=-1, keepdims=True)
    xn = (xf - mu) / jnp.sqrt(var + LN_EPS) * gamma + beta
    h = xn @ w1 + b1
    h = 0.5 * h * (1.0 + jax.lax.erf(h * _INV_SQRT2))
    return (h @ w2 + b2).astype(x.dtype)


def _make_params(key, dim, hidden_dim, affine_noise=False):
    kg, kb, kw1, kb1, kw2, kb2 = jax.random.split(key, 6)
    if affine_noise:
        gamma = 1.0 + 0.1 * jax.random.normal(kg, (dim,), jnp.float32)
        beta = 0.1 * jax.random.normal(kb, (dim,), jnp.float32)
    else:
        gamma = jnp.ones((dim,), jnp.float32)      # nn.LayerNorm default init
        beta = jnp.zeros((dim,), jnp.float32)
    lim1 = 1.0 / math.sqrt(dim)
    w1 = jax.random.uniform(kw1, (dim, hidden_dim), jnp.float32, -lim1, lim1)
    b1 = jax.random.uniform(kb1, (hidden_dim,), jnp.float32, -lim1, lim1)
    lim2 = 1.0 / math.sqrt(hidden_dim)
    w2 = jax.random.uniform(kw2, (hidden_dim, dim), jnp.float32, -lim2, lim2)
    b2 = jax.random.uniform(kb2, (dim,), jnp.float32, -lim2, lim2)
    return gamma, beta, w1, b1, w2, b2


if __name__ == "__main__":
    key = jax.random.PRNGKey(0)
    k1, k2, kp1, kp2 = jax.random.split(key, 4)

    # ---- Test 1: small ViT-MNIST-like shapes (single hidden panel) ----
    B, S, dim, hidden_dim = 2, 8, 32, 64
    x = jax.random.normal(k1, (B, S, dim), dtype=jnp.float32)
    gamma, beta, w1, b1, w2, b2 = _make_params(kp1, dim, hidden_dim)

    out = feed_forward(x, gamma, beta, w1, b1, w2, b2)
    out = jax.block_until_ready(out)
    ref = _reference(x, gamma, beta, w1, b1, w2, b2)
    assert out.shape == x.shape
    # bf16 matmul operands (f32 accumulation) -> documented precision trade.
    assert jnp.allclose(out, ref, atol=3e-2, rtol=3e-2)

    # ---- Test 2: exercises token padding (T=100) and hidden-dim tiling ----
    B2, S2, dim2, hidden2 = 2, 50, 128, 256
    x2 = jax.random.normal(k2, (B2, S2, dim2), dtype=jnp.float32)
    g2, be2, w12, b12, w22, b22 = _make_params(kp2, dim2, hidden2,
                                               affine_noise=True)
    out2 = feed_forward(x2, g2, be2, w12, b12, w22, b22, th=128)
    out2 = jax.block_until_ready(out2)
    ref2 = _reference(x2, g2, be2, w12, b12, w22, b22)
    assert out2.shape == x2.shape
    assert jnp.allclose(out2, ref2, atol=3e-2, rtol=3e-2)

    print("KERNEL_OK")
</pallas_src>

<mosaic_0001>
module attributes {stable_mosaic.version = 11 : i64} {
  func.func @_ffn_kernel(%arg0: i32, %arg1: i32, %arg2: memref<16x32xf32, #tpu.memory_space<vmem>>, %arg3: memref<1x32xf32, #tpu.memory_space<vmem>>, %arg4: memref<1x32xf32, #tpu.memory_space<vmem>>, %arg5: memref<32x64xbf16, #tpu.memory_space<vmem>>, %arg6: memref<1x64xf32, #tpu.memory_space<vmem>>, %arg7: memref<64x32xbf16, #tpu.memory_space<vmem>>, %arg8: memref<1x32xf32, #tpu.memory_space<vmem>>, %arg9: memref<16x32xf32, #tpu.memory_space<vmem>>, %arg10: memref<16x32xbf16, #tpu.memory_space<vmem>>, %arg11: memref<16x32xf32, #tpu.memory_space<vmem>>) attributes {dimension_semantics = [#tpu.dimension_semantics<parallel>, #tpu.dimension_semantics<arbitrary>], iteration_bounds = array<i64: 1, 1>, scalar_prefetch = 0 : i64, scratch_operands = 2 : i64, tpu.core_type = #tpu.core_type<tc>, window_params = [{transform_indices = @transform_0, window_bounds = array<i64: 16, 32>}, {pipeline_mode = #tpu.pipeline_mode<synchronous>, transform_indices = @transform_1, window_bounds = array<i64: 1, 32>}, {pipeline_mode = #tpu.pipeline_mode<synchronous>, transform_indices = @transform_2, window_bounds = array<i64: 1, 32>}, {transform_indices = @transform_3, window_bounds = array<i64: 32, 64>}, {transform_indices = @transform_4, window_bounds = array<i64: 1, 64>}, {transform_indices = @transform_5, window_bounds = array<i64: 64, 32>}, {pipeline_mode = #tpu.pipeline_mode<synchronous>, transform_indices = @transform_6, window_bounds = array<i64: 1, 32>}, {transform_indices = @transform_7, window_bounds = array<i64: 16, 32>}]} {
    %c0_i32 = arith.constant 0 : i32
    %0 = arith.cmpi eq, %arg1, %c0_i32 : i32
    %1 = arith.extui %0 : i1 to i32
    %c0_i32_0 = arith.constant 0 : i32
    %2 = arith.cmpi ne, %1, %c0_i32_0 : i32
    scf.if %2 {
      %c0_18 = arith.constant 0 : index
      %c0_19 = arith.constant 0 : index
      %26 = vector.load %arg2[%c0_18, %c0_19] : memref<16x32xf32, #tpu.memory_space<vmem>>, vector<16x32xf32>
      %cst_20 = arith.constant dense<0.000000e+00> : vector<16xf32>
      %27 = vector.multi_reduction <add>, %26, %cst_20 [1] : vector<16x32xf32> to vector<16xf32>
      %28 = vector.shape_cast %27 : vector<16xf32> to vector<16x1xf32>
      %cst_21 = arith.constant 3.200000e+01 : f32
      %29 = vector.broadcast %cst_21 : f32 to vector<16x1xf32>
      %30 = arith.divf %28, %29 : vector<16x1xf32>
      %31 = vector.broadcast %30 : vector<16x1xf32> to vector<16x32xf32>
      %32 = arith.subf %26, %31 : vector<16x32xf32>
      %33 = vector.broadcast %30 : vector<16x1xf32> to vector<16x32xf32>
      %34 = arith.subf %26, %33 : vector<16x32xf32>
      %35 = arith.mulf %32, %34 : vector<16x32xf32>
      %cst_22 = arith.constant dense<0.000000e+00> : vector<16xf32>
      %36 = vector.multi_reduction <add>, %35, %cst_22 [1] : vector<16x32xf32> to vector<16xf32>
      %37 = vector.shape_cast %36 : vector<16xf32> to vector<16x1xf32>
      %cst_23 = arith.constant 3.200000e+01 : f32
      %38 = vector.broadcast %cst_23 : f32 to vector<16x1xf32>
      %39 = arith.divf %37, %38 : vector<16x1xf32>
      %40 = vector.broadcast %30 : vector<16x1xf32> to vector<16x32xf32>
      %41 = arith.subf %26, %40 : vector<16x32xf32>
      %cst_24 = arith.constant 9.99999974E-6 : f32
      %42 = vector.broadcast %cst_24 : f32 to vector<16x1xf32>
      %43 = arith.addf %39, %42 : vector<16x1xf32>
      %44 = math.rsqrt %43 : vector<16x1xf32>
      %45 = vector.broadcast %44 : vector<16x1xf32> to vector<16x32xf32>
      %46 = arith.mulf %41, %45 : vector<16x32xf32>
      %c0_25 = arith.constant 0 : index
      %c0_26 = arith.constant 0 : index
      %47 = vector.load %arg3[%c0_25, %c0_26] : memref<1x32xf32, #tpu.memory_space<vmem>>, vector<1x32xf32>
      %48 = vector.broadcast %47 : vector<1x32xf32> to vector<16x32xf32>
      %49 = arith.mulf %46, %48 : vector<16x32xf32>
      %c0_27 = arith.constant 0 : index
      %c0_28 = arith.constant 0 : index
      %50 = vector.load %arg4[%c0_27, %c0_28] : memref<1x32xf32, #tpu.memory_space<vmem>>, vector<1x32xf32>
      %51 = vector.broadcast %50 : vector<1x32xf32> to vector<16x32xf32>
      %52 = arith.addf %49, %51 : vector<16x32xf32>
      %53 = arith.truncf %52 : vector<16x32xf32> to vector<16x32xbf16>
      %c0_29 = arith.constant 0 : index
      %c0_30 = arith.constant 0 : index
      %54 = vector.load %arg10[%c0_29, %c0_30] : memref<16x32xbf16, #tpu.memory_space<vmem>>, vector<16x32xbf16>
      tpu.vector_store %arg10[%c0_29, %c0_30], %53 {strides = array<i32>} : memref<16x32xbf16, #tpu.memory_space<vmem>>, vector<16x32xbf16>,
      %cst_31 = arith.constant 0.000000e+00 : f32
      %55 = vector.broadcast %cst_31 : f32 to vector<16x32xf32>
      %c0_32 = arith.constant 0 : index
      %c0_33 = arith.constant 0 : index
      %56 = vector.load %arg11[%c0_32, %c0_33] : memref<16x32xf32, #tpu.memory_space<vmem>>, vector<16x32xf32>
      tpu.vector_store %arg11[%c0_32, %c0_33], %55 {strides = array<i32>} : memref<16x32xf32, #tpu.memory_space<vmem>>, vector<16x32xf32>,
    } else {
    }
    %c0 = arith.constant 0 : index
    %c0_1 = arith.constant 0 : index
    %3 = vector.load %arg10[%c0, %c0_1] : memref<16x32xbf16, #tpu.memory_space<vmem>>, vector<16x32xbf16>
    %c0_2 = arith.constant 0 : index
    %c0_3 = arith.constant 0 : index
    %4 = vector.load %arg5[%c0_2, %c0_3] : memref<32x64xbf16, #tpu.memory_space<vmem>>, vector<32x64xbf16>
    %cst = arith.constant dense<0.000000e+00> : vector<16x64xf32>
    %5 = tpu.matmul %3, %4, %cst {dimension_numbers = #tpu.dot_dimension_numbers<[1], [0], [0], [1], [0, 0, 1, 1], [], []>} : vector<16x32xbf16>, vector<32x64xbf16>, vector<16x64xf32> -> vector<16x64xf32>
    %c0_4 = arith.constant 0 : index
    %c0_5 = arith.constant 0 : index
    %6 = vector.load %arg6[%c0_4, %c0_5] : memref<1x64xf32, #tpu.memory_space<vmem>>, vector<1x64xf32>
    %7 = vector.broadcast %6 : vector<1x64xf32> to vector<16x64xf32>
    %8 = arith.addf %5, %7 : vector<16x64xf32>
    %cst_6 = arith.constant 5.000000e-01 : f32
    %9 = vector.broadcast %cst_6 : f32 to vector<16x64xf32>
    %10 = arith.mulf %9, %8 : vector<16x64xf32>
    %cst_7 = arith.constant 0.707106769 : f32
    %11 = vector.broadcast %cst_7 : f32 to vector<16x64xf32>
    %12 = arith.mulf %8, %11 : vector<16x64xf32>
    %13 = math.erf %12 : vector<16x64xf32>
    %cst_8 = arith.constant 1.000000e+00 : f32
    %14 = vector.broadcast %cst_8 : f32 to vector<16x64xf32>
    %15 = arith.addf %14, %13 : vector<16x64xf32>
    %16 = arith.mulf %10, %15 : vector<16x64xf32>
    %c0_9 = arith.constant 0 : index
    %c0_10 = arith.constant 0 : index
    %17 = vector.load %arg11[%c0_9, %c0_10] : memref<16x32xf32, #tpu.memory_space<vmem>>, vector<16x32xf32>
    %18 = arith.truncf %16 : vector<16x64xf32> to vector<16x64xbf16>
    %c0_11 = arith.constant 0 : index
    %c0_12 = arith.constant 0 : index
    %19 = vector.load %arg7[%c0_11, %c0_12] : memref<64x32xbf16, #tpu.memory_space<vmem>>, vector<64x32xbf16>
    %cst_13 = arith.constant dense<0.000000e+00> : vector<16x32xf32>
    %20 = tpu.matmul %18, %19, %cst_13 {dimension_numbers = #tpu.dot_dimension_numbers<[1], [0], [0], [1], [0, 0, 1, 1], [], []>} : vector<16x64xbf16>, vector<64x32xbf16>, vector<16x32xf32> -> vector<16x32xf32>
    %21 = arith.addf %17, %20 : vector<16x32xf32>
    %c0_14 = arith.constant 0 : index
    %c0_15 = arith.constant 0 : index
    %22 = vector.load %arg11[%c0_14, %c0_15] : memref<16x32xf32, #tpu.memory_space<vmem>>, vector<16x32xf32>
    tpu.vector_store %arg11[%c0_14, %c0_15], %21 {strides = array<i32>} : memref<16x32xf32, #tpu.memory_space<vmem>>, vector<16x32xf32>,
    %c0_i32_16 = arith.constant 0 : i32
    %23 = arith.cmpi eq, %arg1, %c0_i32_16 : i32
    %24 = arith.extui %23 : i1 to i32
    %c0_i32_17 = arith.constant 0 : i32
    %25 = arith.cmpi ne, %24, %c0_i32_17 : i32
    scf.if %25 {
      %c0_18 = arith.constant 0 : index
      %c0_19 = arith.constant 0 : index
      %26 = vector.load %arg11[%c0_18, %c0_19] : memref<16x32xf32, #tpu.memory_space<vmem>>, vector<16x32xf32>
      %c0_20 = arith.constant 0 : index
      %c0_21 = arith.constant 0 : index
      %27 = vector.load %arg8[%c0_20, %c0_21] : memref<1x32xf32, #tpu.memory_space<vmem>>, vector<1x32xf32>
      %28 = vector.broadcast %27 : vector<1x32xf32> to vector<16x32xf32>
      %29 = arith.addf %26, %28 : vector<16x32xf32>
      %c0_22 = arith.constant 0 : index
      %c0_23 = arith.constant 0 : index
      %30 = vector.load %arg9[%c0_22, %c0_23] : memref<16x32xf32, #tpu.memory_space<vmem>>, vector<16x32xf32>
      tpu.vector_store %arg9[%c0_22, %c0_23], %29 {strides = array<i32>} : memref<16x32xf32, #tpu.memory_space<vmem>>, vector<16x32xf32>,
    } else {
    }
    return
  }
  func.func @transform_0(%arg0: i32, %arg1: i32) -> (i32, i32) {
    %c0_i32 = arith.constant 0 : i32
    %c0_i32_0 = arith.constant 0 : i32
    return %arg0, %c0_i32 : i32, i32
  }
  func.func @transform_1(%arg0: i32, %arg1: i32) -> (i32, i32) {
    %c0_i32 = arith.constant 0 : i32
    %c0_i32_0 = arith.constant 0 : i32
    %c0_i32_1 = arith.constant 0 : i32
    return %c0_i32, %c0_i32_0 : i32, i32
  }
  func.func @transform_2(%arg0: i32, %arg1: i32) -> (i32, i32) {
    %c0_i32 = arith.constant 0 : i32
    %c0_i32_0 = arith.constant 0 : i32
    %c0_i32_1 = arith.constant 0 : i32
    return %c0_i32, %c0_i32_0 : i32, i32
  }
  func.func @transform_3(%arg0: i32, %arg1: i32) -> (i32, i32) {
    %c0_i32 = arith.constant 0 : i32
    %c0_i32_0 = arith.constant 0 : i32
    return %c0_i32, %arg1 : i32, i32
  }
  func.func @transform_4(%arg0: i32, %arg1: i32) -> (i32, i32) {
    %c0_i32 = arith.constant 0 : i32
    %c0_i32_0 = arith.constant 0 : i32
    return %c0_i32, %arg1 : i32, i32
  }
  func.func @transform_5(%arg0: i32, %arg1: i32) -> (i32, i32) {
    %c0_i32 = arith.constant 0 : i32
    %c0_i32_0 = arith.constant 0 : i32
    return %arg1, %c0_i32 : i32, i32
  }
  func.func @transform_6(%arg0: i32, %arg1: i32) -> (i32, i32) {
    %c0_i32 = arith.constant 0 : i32
    %c0_i32_0 = arith.constant 0 : i32
    %c0_i32_1 = arith.constant 0 : i32
    return %c0_i32, %c0_i32_0 : i32, i32
  }
  func.func @transform_7(%arg0: i32, %arg1: i32) -> (i32, i32) {
    %c0_i32 = arith.constant 0 : i32
    %c0_i32_0 = arith.constant 0 : i32
    return %arg0, %c0_i32 : i32, i32
  }
}

</mosaic_0001>

<bundles_post_ra>
// kernel: tpu_custom_call.1
= control target key start
LH: loop header
LB: loop body
LE: loop exit
PB: predicated region body
PF: predicated region fallthrough
CT: control target
= control target key end

     0   :  { %vm34_vm0 = vcmask 261120   ;;  %s467_s0 = inlined_call_operand.vmem [shape: f32[16,32], index: 0, kind: input, shape index: {}]   ;;  %s468_s1 = inlined_call_operand.vmem [shape: f32[1,32], index: 1, kind: input, shape index: {}]   ;;  %s469_s2 = inlined_call_operand.vmem [shape: f32[1,32], index: 2, kind: input, shape index: {}]   ;;  %s470_s3 = inlined_call_operand.vmem [shape: bf16[32,64], index: 3, kind: input, shape index: {}]   ;;  %s471_s4 = inlined_call_operand.vmem [shape: f32[1,64], index: 4, kind: input, shape index: {}]   ;;  %s472_s5 = inlined_call_operand.vmem [shape: bf16[64,32], index: 5, kind: input, shape index: {}]   ;;  %s473_s6 = inlined_call_operand.vmem [shape: f32[1,32], index: 6, kind: input, shape index: {}]   ;;  %s474_s7 = inlined_call_operand.hbm [shape: f32[16,32], index: 7, kind: output, shape index: {}]  }
   0x1   :  { %v32_v0 = vld [vmem:[%s467_s0] sm:$0xff]  ;;  %v33_v1 = vld [vmem:[%s467_s0 + $0x8] sm:$0xff] }
   0x2   :  { %v35_v2 = vsel %vm34_vm0, %v32_v0, 0.0  ;;  %v38_v3 = vsel %vm34_vm0, %v33_v1, 0.0 }
   0x3   :  { %36 = vadd.xlane.f32.xlu0 %v35_v2 }
   0x4   :  { %12 = vsyncpa [#allocation5], 0  ;;  %v324_v14 = vld [vmem:[%s470_s3] sm:$0xff]   ;;  %v362_v15 = vmov 0.0   ;;  %v325_v16 = vld [vmem:[%s470_s3 + $0x8] sm:$0xff]   ;;  %vm363_vm1 = vmmov 0  }
   0x5   :  { %299 = vmatprep.subr.bf16.mxu0 %v362_v15  ;;  %82 = vst.msk [vmem:[#allocation3] sm:$0xff] %vm34_vm0, %v362_v15  ;;  %83 = vst.msk [vmem:[#allocation3 + $0x8] sm:$0xff] %vm34_vm0, %v362_v15  ;;  %307 = vmatprep.subr.bf16.mxu1 %v362_v15  ;;  %v279_v25 = vld [vmem:[%s468_s1] ss:$0 sm:$0xff]  ;;  %v327_v36 = vld [vmem:[%s472_s5 + $0x8] sm:$0xff]   ;;  %vm198_vm2 = vcmask 523264  }
   0x6   :  { %300 = vmatpush3.bf16.msra.mxu0 %v324_v14  ;;  %303 = vmatprep.mubr.msk.bf16.mxu0 %vm363_vm1, %v362_v15  ;;  %v280_v29 = vld [vmem:[%s469_s2] ss:$0 sm:$0xff]  ;;  %v328_v37 = vld [vmem:[%s472_s5 + $0x10] sm:$0xff]   ;;  %v329_v38 = vld [vmem:[%s472_s5 + $0x18] sm:$0xff]   ;;  %s364_s19 = smov [#allocation4]  }
   0x7   :  { %39 = vadd.xlane.f32.xlu0 %v38_v3  ;;  %301 = vmatprep.subr.bf16.mxu0 %v362_v15  ;;  %v326_v35 = vld [vmem:[%s472_s5] sm:$0xff]   ;;  %s268_s20 = sshll.u32 %s364_s19, 4  ;;  %s269_s20 = int_to_ptr.vmem [resolvable:$true] %s268_s20 }
   0x8   :  { %315 = vmatprep.mubr.msk.bf16.mxu1 %vm363_vm1, %v362_v15  ;;  %308 = vmatpush3.bf16.msra.mxu1 %v326_v35  ;;  %v281_v39 = vld [vmem:[%s471_s4] ss:$0 sm:$0xff]  ;;  %s338_s21 = scalar_lea.vmem %s269_s20, 256  ;;  %p343_p1 = scmp.lt.s32.totalorder %s269_s20, %s269_s20 }
   0x9   :  { %309 = vmatprep.subr.bf16.mxu1 %v362_v15  ;;  %p339_p0 = scmp.ne.s32.totalorder %s269_s20, %s338_s21  ;;  %p344_p2 = scmp.lt.s32.totalorder %s338_s21, %s338_s21 }
   0xa   :  { %302 = vmatpush3.bf16.msra.mxu0 %v325_v16 }
   0xb   :  { %p345_p3 = por %p344_p2, %p343_p1 }
   0xc   :  { %310 = vmatpush3.bf16.msra.mxu1 %v327_v36  ;;  %v163_v57 = vld [vmem:[#allocation3] sm:$0xff]  ;;  %v164_v59 = vld [vmem:[#allocation3 + $0x8] sm:$0xff] }
   0xd   :  { %311 = vmatprep.subr.bf16.mxu1 %v362_v15  ;;  %p346_p4 = pnand %p345_p3, %p339_p0 }
  0x10   :  { %312 = vmatpush3.bf16.msra.mxu1 %v328_v37 }
  0x11   :  { %313 = vmatprep.subr.bf16.mxu1 %v362_v15 }
  0x14   :  { %314 = vmatpush3.bf16.msra.mxu1 %v329_v38 }
  0x90   :  { %v37_v4 = vpop.xlane.xlu0 %36 }
  0x91   :  { %v42_v5 = vmul.f32 0.03125, %v37_v4 }
  0x93   :  { %v44_v6 = vsub.f32 %v32_v0, %v42_v5 }
  0x94   :  { %v40_v7 = vpop.xlane.xlu0 %39 }
  0x95   :  { %v43_v8 = vmul.f32 0.03125, %v40_v7  ;;  %v46_v9 = vmul.f32 %v44_v6, %v44_v6 }
  0x97   :  { %v45_v10 = vsub.f32 %v33_v1, %v43_v8  ;;  %v48_v11 = vsel %vm34_vm0, %v46_v9, 0.0  ;;  %v290_v1 = vld [vmem:[%s473_s6] ss:$0 sm:$0xff] }
  0x98   :  { %49 = vadd.xlane.f32.xlu1 %v48_v11 }
  0x99   :  { %v47_v12 = vmul.f32 %v45_v10, %v45_v10 }
  0x9b   :  { %v51_v13 = vsel %vm34_vm0, %v47_v12, 0.0 }
  0x9c   :  { %52 = vadd.xlane.f32.xlu1 %v51_v13 }
 0x125   :  { %v50_v17 = vpop.xlane.xlu1 %49 }
 0x126   :  { %v54_v18 = vmul.f32 0.03125, %v50_v17 }
 0x128   :  { %v56_v19 = vadd.f32 1e-05, %v54_v18 }
 0x129   :  { %v53_v20 = vpop.xlane.xlu1 %52 }
 0x12a   :  { %330 = vrsqrt.f32 %v56_v19  ;;  %v55_v21 = vmul.f32 0.03125, %v53_v20 }
 0x12c   :  { %v57_v22 = vadd.f32 1e-05, %v55_v21 }
 0x12e   :  { %332 = vrsqrt.f32 %v57_v22 }
 0x134   :  { %v331_v23 = vpop.eup %330 }
 0x135   :  { %v60_v24 = vmul.f32 %v331_v23, %v44_v6 }
 0x137   :  { %v69_v27 = vmul.f32 %v279_v25, %v60_v24 }
 0x138   :  { %v333_v26 = vpop.eup %332 }
 0x139   :  { %v61_v28 = vmul.f32 %v333_v26, %v45_v10  ;;  %v78_v31 = vadd.f32 %v280_v29, %v69_v27 }
 0x13b   :  { %v70_v30 = vmul.f32 %v279_v25, %v61_v28 }
 0x13d   :  { %v79_v32 = vadd.f32 %v280_v29, %v70_v30 }
 0x13f   :  { %v80_v33 = vpack.c.bf16 %v79_v32, %v78_v31 }
 0x141   :  { %81 = vst.msk [vmem:[#allocation2] sm:$0xff] %vm34_vm0, %v80_v33 }
 0x148   :  { %v84_v34 = vld [vmem:[#allocation2] sm:$0xff] }
 0x149   :  { %304 = vmatmul.mubr.msk.bf16.vlgmr.msra.gmra.mrb[0].mxu0 %vm34_vm0, %v84_v34 }
 0x21c   :  { %v146_v40 = vpop.f32.mrb[0].mxu0 }
 0x21d   :  { %v147_v41 = vadd.f32 %v281_v39, %v146_v40  ;;  %v305_v42 = vpop.f32.mrb[1].mxu0 }
 0x21e   :  { %v149_v43 = vpop.f32.mrb[2].mxu0 }
 0x21f   :  { %v155_v44 = vmul.f32 0.70710677, %v147_v41  ;;  %v150_v45 = vadd.f32 %v281_v39, %v149_v43  ;;  %v306_v46 = vpop.f32.mrb[3].mxu0  ;;  %v153_v51 = vmul.f32 0.5, %v147_v41 }
 0x221   :  { %334 = verf.f32 %v155_v44  ;;  %v156_v47 = vmul.f32 0.70710677, %v150_v45  ;;  %v154_v52 = vmul.f32 0.5, %v150_v45 }
 0x223   :  { %336 = verf.f32 %v156_v47 }
 0x22b   :  { %v335_v48 = vpop.eup %334 }
 0x22c   :  { %v159_v49 = vadd.f32 1.0, %v335_v48 }
 0x22d   :  { %v337_v50 = vpop.eup %336 }
 0x22e   :  { %v160_v53 = vadd.f32 1.0, %v337_v50  ;;  %v161_v54 = vmul.f32 %v159_v49, %v153_v51 }
 0x230   :  { %v162_v55 = vmul.f32 %v160_v53, %v154_v52 }
 0x232   :  { %v165_v56 = vpack.c.bf16 %v162_v55, %v161_v54 }
 0x234   :  { %316 = vmatmul.mubr.msk.bf16.vlgmr.msra.gmra.mrb[0].mxu1 %vm198_vm2, %v165_v56 }
 0x307   :  { %v236_v58 = vpop.f32.mrb[0].mxu1 }
 0x308   :  { %v243_v60 = vadd.f32 %v236_v58, %v163_v57  ;;  %v317_v61 = vpop.f32.mrb[1].mxu1 }
 0x309   :  { %v239_v62 = vpop.f32.mrb[2].mxu1 }
 0x30a   :  { %245 = vst.msk [vmem:[#allocation3] sm:$0xff] %vm34_vm0, %v243_v60  ;;  %v244_v63 = vadd.f32 %v239_v62, %v164_v59  ;;  %v318_v0 = vpop.f32.mrb[3].mxu1 }
 0x30c   :  { %246 = vst.msk [vmem:[#allocation3 + $0x8] sm:$0xff] %vm34_vm0, %v244_v63 }
 0x311   :  { %v250_v2 = vld [vmem:[#allocation3] sm:$0xff] }
 0x312   :  { %v259_v3 = vadd.f32 %v290_v1, %v250_v2 }
 0x313   :  { %v251_v4 = vld [vmem:[#allocation3 + $0x8] sm:$0xff] }
 0x314   :  { %v260_v5 = vadd.f32 %v290_v1, %v251_v4  ;;  %261 = vst.msk [vmem:[#allocation4] sm:$0xff] %vm34_vm0, %v259_v3 }
 0x316   :  { %262 = vst.msk [vmem:[#allocation4 + $0x8] sm:$0xff] %vm34_vm0, %v260_v5 }
 0x317   :  { %349 = shalt.err (!%p346_p4)
}
 0x318   :  { %s350_s23 = scalar_lea.hbm %s474_s7, 256 }
 0x319   :  { %p351_p5 = scmp.ne.s32.totalorder %s474_s7, %s350_s23  ;;  %p354_p6 = scmp.lt.u32.totalorder %s350_s23, %s474_s7 }
 0x31b   :  { %p356_p7 = pnand %p354_p6, %p351_p5 }
 0x31d   :  { %359 = shalt.err (!%p356_p7)
}
 0x31e   :  { %s365_s0 = smov 128   ;;  %s366_s28 = smov 8  }
 0x31f   :  { %274 = dma.vmem_to_hbm [thread:$0]  %s269_s20, 256, %s474_s7, [#allocation5], %s365_s0, %s365_s0, %s366_s28  }
 0x320   :  { %360 = dma.done.wait [#allocation5], 256  }
 0x321   :  { %361 = vsyncadd [#allocation5], 4294967040 }
 0x322   :  { %278 = vsyncpa [#allocation5], 1 }

</bundles_post_ra>
